<compile_context>
chip_gen: v7x
topology: tpu7x:2x2x1
jax: 0.10.0
libtpu: 0.0.40
codegen_flags: <defaults>
</compile_context>

<pallas_src>
import functools

import jax
import jax.numpy as jnp
from jax.experimental import pallas as pl
from jax.experimental.pallas import tpu as pltpu


def _round_up(x: int, m: int) -> int:
    return ((x + m - 1) // m) * m


def _ncc_kernel(pred_ref, gt_ref, out_ref,
                sp_ref, sg_ref, spp_ref, sgg_ref, spg_ref, *, inv_n):
    """Grid = (batch_blocks, sample_tiles).

    Axis 0 ("parallel") walks blocks of TB samples; axis 1 ("arbitrary") walks
    TN-wide tiles of each sample, accumulating five raw moments per sample in
    VMEM scratch of shape (TB, 1).  The per-sample NCC is finalized and written
    to the (TB, 128) output block on the last tile of the sample.
    """
    j = pl.program_id(1)
    nj = pl.num_programs(1)

    # Cast after DMA: tiles travel over HBM in their native dtype.
    p = pred_ref[...].astype(jnp.float32)   # (TB, TN)
    g = gt_ref[...].astype(jnp.float32)     # (TB, TN)

    @pl.when(j == 0)
    def _():
        sp_ref[...] = jnp.zeros_like(sp_ref)
        sg_ref[...] = jnp.zeros_like(sg_ref)
        spp_ref[...] = jnp.zeros_like(spp_ref)
        sgg_ref[...] = jnp.zeros_like(sgg_ref)
        spg_ref[...] = jnp.zeros_like(spg_ref)

    # One-pass raw moments (per-sample partial sums of shape (TB, 1)).
    sp_ref[...] += jnp.sum(p, axis=-1, keepdims=True)
    sg_ref[...] += jnp.sum(g, axis=-1, keepdims=True)
    spp_ref[...] += jnp.sum(p * p, axis=-1, keepdims=True)
    sgg_ref[...] += jnp.sum(g * g, axis=-1, keepdims=True)
    spg_ref[...] += jnp.sum(p * g, axis=-1, keepdims=True)

    @pl.when(j == nj - 1)
    def _():
        s_p = sp_ref[...]
        s_g = sg_ref[...]
        num = spg_ref[...] - s_p * s_g * inv_n
        d1 = spp_ref[...] - s_p * s_p * inv_n
        d2 = sgg_ref[...] - s_g * s_g * inv_n
        ncc = num / jnp.sqrt(d1 * d2)                     # (TB, 1)
        out_ref[...] = jnp.broadcast_to(ncc, out_ref.shape)


def ncc_loss(pred: jax.Array, gt: jax.Array) -> jax.Array:
    """pred, gt: [B, ...] (e.g. [B, 1, D, H, W]); returns the scalar NCC loss."""
    assert pred.shape == gt.shape
    B = pred.shape[0]
    p2 = pred.reshape(B, -1)
    g2 = gt.reshape(B, -1)
    n_true = p2.shape[1]

    itemsize = p2.dtype.itemsize
    target_elems = (1 << 20) // itemsize         # ~1 MiB per input block
    n_pad = _round_up(n_true, 128)

    if B * n_pad <= target_elems:
        # Everything fits in a single modest block.
        tb, tn = B, n_pad
    else:
        cap_rows = max(1, target_elems // (8 * 128))   # rows of 128 lanes
        r = n_pad // 128
        if r <= cap_rows:
            # Small samples: pack several per block to amortize per-step cost.
            tb = max(8, min((target_elems // n_pad) // 8 * 8, _round_up(B, 8)))
            tn = n_pad
        else:
            # Large samples: tile the per-sample axis. Pick the largest tile
            # (multiple of 128 lanes) that divides the padded sample so no
            # extra padding pass over HBM is needed.
            d = 1
            for cand in range(cap_rows, 0, -1):
                if r % cand == 0:
                    d = cand
                    break
            tn = d * 128
            tb = B if B * tn * itemsize <= (2 << 20) else 8

    b_pad = _round_up(B, tb)
    if n_pad != n_true or b_pad != B:
        # Zero padding is exact for raw moments (divisor is the true n);
        # zero-padded batch rows yield NaN and are sliced off before the mean.
        p2 = jnp.pad(p2, ((0, b_pad - B), (0, n_pad - n_true)))
        g2 = jnp.pad(g2, ((0, b_pad - B), (0, n_pad - n_true)))

    grid = (b_pad // tb, n_pad // tn)

    out = pl.pallas_call(
        functools.partial(_ncc_kernel, inv_n=1.0 / float(n_true)),
        out_shape=jax.ShapeDtypeStruct((b_pad, 128), jnp.float32),
        grid_spec=pltpu.PrefetchScalarGridSpec(
            num_scalar_prefetch=0,
            grid=grid,
            in_specs=[
                pl.BlockSpec((tb, tn), lambda i, j: (i, j)),
                pl.BlockSpec((tb, tn), lambda i, j: (i, j)),
            ],
            out_specs=pl.BlockSpec((tb, 128), lambda i, j: (i, 0)),
            scratch_shapes=[pltpu.VMEM((tb, 1), jnp.float32)] * 5,
        ),
        compiler_params=pltpu.CompilerParams(
            dimension_semantics=("parallel", "arbitrary"),
        ),
    )(p2, g2)

    # Final mean over the batch (trivial) stays in the JAX wrapper so the
    # batch grid axis can remain "parallel".
    return jnp.mean(out[:B, 0])


def _ncc_loss_ref(pred: jax.Array, gt: jax.Array) -> jax.Array:
    """Pure-JAX reference mirroring the PyTorch forward exactly (two-pass)."""
    B = pred.shape[0]
    p = pred.reshape(B, -1).astype(jnp.float32)
    g = gt.reshape(B, -1).astype(jnp.float32)
    mp = jnp.mean(p, axis=-1, keepdims=True)
    mg = jnp.mean(g, axis=-1, keepdims=True)
    num = jnp.sum((p - mp) * (g - mg), axis=-1)
    d1 = jnp.sum((p - mp) ** 2, axis=-1)
    d2 = jnp.sum((g - mg) ** 2, axis=-1)
    return jnp.mean(num / jnp.sqrt(d1 * d2))


if __name__ == "__main__":
    key = jax.random.PRNGKey(0)

    # Small case: [B, 1, D, H, W] as in the module docstring; single-block path.
    k1, k2, k3, k4 = jax.random.split(key, 4)
    pred_s = jax.random.normal(k1, (2, 1, 4, 8, 8), dtype=jnp.float32)
    gt_s = 0.7 * pred_s + 0.3 * jax.random.normal(k2, (2, 1, 4, 8, 8),
                                                  dtype=jnp.float32)
    out_s = jax.block_until_ready(ncc_loss(pred_s, gt_s))
    ref_s = jax.block_until_ready(_ncc_loss_ref(pred_s, gt_s))
    assert jnp.allclose(out_s, ref_s, atol=1e-5, rtol=1e-5), (out_s, ref_s)

    # Larger case: exercises the tiled (multi-step accumulation) path.
    pred_l = jax.random.normal(k3, (3, 1, 32, 64, 64), dtype=jnp.float32)
    gt_l = 0.7 * pred_l + 0.3 * jax.random.normal(k4, (3, 1, 32, 64, 64),
                                                  dtype=jnp.float32)
    out_l = jax.block_until_ready(ncc_loss(pred_l, gt_l))
    ref_l = jax.block_until_ready(_ncc_loss_ref(pred_l, gt_l))
    # Looser tolerance: f32 reduction order differs between kernel and XLA ref.
    assert jnp.allclose(out_l, ref_l, atol=1e-4, rtol=1e-4), (out_l, ref_l)

    print("KERNEL_OK")
</pallas_src>

<mosaic_0001>
module attributes {stable_mosaic.version = 11 : i64} {
  func.func @_ncc_kernel(%arg0: i32, %arg1: i32, %arg2: memref<2x256xf32, #tpu.memory_space<vmem>>, %arg3: memref<2x256xf32, #tpu.memory_space<vmem>>, %arg4: memref<2x128xf32, #tpu.memory_space<vmem>>, %arg5: memref<2x1xf32, #tpu.memory_space<vmem>>, %arg6: memref<2x1xf32, #tpu.memory_space<vmem>>, %arg7: memref<2x1xf32, #tpu.memory_space<vmem>>, %arg8: memref<2x1xf32, #tpu.memory_space<vmem>>, %arg9: memref<2x1xf32, #tpu.memory_space<vmem>>) attributes {dimension_semantics = [#tpu.dimension_semantics<parallel>, #tpu.dimension_semantics<arbitrary>], iteration_bounds = array<i64: 1, 1>, scalar_prefetch = 0 : i64, scratch_operands = 5 : i64, tpu.core_type = #tpu.core_type<tc>, window_params = [{transform_indices = @transform_0, window_bounds = array<i64: 2, 256>}, {transform_indices = @transform_1, window_bounds = array<i64: 2, 256>}, {transform_indices = @transform_2, window_bounds = array<i64: 2, 128>}]} {
    %c0 = arith.constant 0 : index
    %c0_0 = arith.constant 0 : index
    %0 = vector.load %arg2[%c0, %c0_0] : memref<2x256xf32, #tpu.memory_space<vmem>>, vector<2x256xf32>
    %c0_1 = arith.constant 0 : index
    %c0_2 = arith.constant 0 : index
    %1 = vector.load %arg3[%c0_1, %c0_2] : memref<2x256xf32, #tpu.memory_space<vmem>>, vector<2x256xf32>
    %c0_i32 = arith.constant 0 : i32
    %2 = arith.cmpi eq, %arg1, %c0_i32 : i32
    %3 = arith.extui %2 : i1 to i32
    %c0_i32_3 = arith.constant 0 : i32
    %4 = arith.cmpi ne, %3, %c0_i32_3 : i32
    scf.if %4 {
      %cst_30 = arith.constant 0.000000e+00 : f32
      %36 = vector.broadcast %cst_30 : f32 to vector<2x1xf32>
      %c0_31 = arith.constant 0 : index
      %c0_32 = arith.constant 0 : index
      %37 = vector.load %arg5[%c0_31, %c0_32] : memref<2x1xf32, #tpu.memory_space<vmem>>, vector<2x1xf32>
      tpu.vector_store %arg5[%c0_31, %c0_32], %36 {strides = array<i32>} : memref<2x1xf32, #tpu.memory_space<vmem>>, vector<2x1xf32>,
      %cst_33 = arith.constant 0.000000e+00 : f32
      %38 = vector.broadcast %cst_33 : f32 to vector<2x1xf32>
      %c0_34 = arith.constant 0 : index
      %c0_35 = arith.constant 0 : index
      %39 = vector.load %arg6[%c0_34, %c0_35] : memref<2x1xf32, #tpu.memory_space<vmem>>, vector<2x1xf32>
      tpu.vector_store %arg6[%c0_34, %c0_35], %38 {strides = array<i32>} : memref<2x1xf32, #tpu.memory_space<vmem>>, vector<2x1xf32>,
      %cst_36 = arith.constant 0.000000e+00 : f32
      %40 = vector.broadcast %cst_36 : f32 to vector<2x1xf32>
      %c0_37 = arith.constant 0 : index
      %c0_38 = arith.constant 0 : index
      %41 = vector.load %arg7[%c0_37, %c0_38] : memref<2x1xf32, #tpu.memory_space<vmem>>, vector<2x1xf32>
      tpu.vector_store %arg7[%c0_37, %c0_38], %40 {strides = array<i32>} : memref<2x1xf32, #tpu.memory_space<vmem>>, vector<2x1xf32>,
      %cst_39 = arith.constant 0.000000e+00 : f32
      %42 = vector.broadcast %cst_39 : f32 to vector<2x1xf32>
      %c0_40 = arith.constant 0 : index
      %c0_41 = arith.constant 0 : index
      %43 = vector.load %arg8[%c0_40, %c0_41] : memref<2x1xf32, #tpu.memory_space<vmem>>, vector<2x1xf32>
      tpu.vector_store %arg8[%c0_40, %c0_41], %42 {strides = array<i32>} : memref<2x1xf32, #tpu.memory_space<vmem>>, vector<2x1xf32>,
      %cst_42 = arith.constant 0.000000e+00 : f32
      %44 = vector.broadcast %cst_42 : f32 to vector<2x1xf32>
      %c0_43 = arith.constant 0 : index
      %c0_44 = arith.constant 0 : index
      %45 = vector.load %arg9[%c0_43, %c0_44] : memref<2x1xf32, #tpu.memory_space<vmem>>, vector<2x1xf32>
      tpu.vector_store %arg9[%c0_43, %c0_44], %44 {strides = array<i32>} : memref<2x1xf32, #tpu.memory_space<vmem>>, vector<2x1xf32>,
    } else {
    }
    %c0_4 = arith.constant 0 : index
    %c0_5 = arith.constant 0 : index
    %5 = vector.load %arg5[%c0_4, %c0_5] : memref<2x1xf32, #tpu.memory_space<vmem>>, vector<2x1xf32>
    %cst = arith.constant dense<0.000000e+00> : vector<2xf32>
    %6 = vector.multi_reduction <add>, %0, %cst [1] : vector<2x256xf32> to vector<2xf32>
    %7 = vector.shape_cast %6 : vector<2xf32> to vector<2x1xf32>
    %8 = arith.addf %5, %7 : vector<2x1xf32>
    %c0_6 = arith.constant 0 : index
    %c0_7 = arith.constant 0 : index
    %9 = vector.load %arg5[%c0_6, %c0_7] : memref<2x1xf32, #tpu.memory_space<vmem>>, vector<2x1xf32>
    tpu.vector_store %arg5[%c0_6, %c0_7], %8 {strides = array<i32>} : memref<2x1xf32, #tpu.memory_space<vmem>>, vector<2x1xf32>,
    %c0_8 = arith.constant 0 : index
    %c0_9 = arith.constant 0 : index
    %10 = vector.load %arg6[%c0_8, %c0_9] : memref<2x1xf32, #tpu.memory_space<vmem>>, vector<2x1xf32>
    %cst_10 = arith.constant dense<0.000000e+00> : vector<2xf32>
    %11 = vector.multi_reduction <add>, %1, %cst_10 [1] : vector<2x256xf32> to vector<2xf32>
    %12 = vector.shape_cast %11 : vector<2xf32> to vector<2x1xf32>
    %13 = arith.addf %10, %12 : vector<2x1xf32>
    %c0_11 = arith.constant 0 : index
    %c0_12 = arith.constant 0 : index
    %14 = vector.load %arg6[%c0_11, %c0_12] : memref<2x1xf32, #tpu.memory_space<vmem>>, vector<2x1xf32>
    tpu.vector_store %arg6[%c0_11, %c0_12], %13 {strides = array<i32>} : memref<2x1xf32, #tpu.memory_space<vmem>>, vector<2x1xf32>,
    %c0_13 = arith.constant 0 : index
    %c0_14 = arith.constant 0 : index
    %15 = vector.load %arg7[%c0_13, %c0_14] : memref<2x1xf32, #tpu.memory_space<vmem>>, vector<2x1xf32>
    %16 = arith.mulf %0, %0 : vector<2x256xf32>
    %cst_15 = arith.constant dense<0.000000e+00> : vector<2xf32>
    %17 = vector.multi_reduction <add>, %16, %cst_15 [1] : vector<2x256xf32> to vector<2xf32>
    %18 = vector.shape_cast %17 : vector<2xf32> to vector<2x1xf32>
    %19 = arith.addf %15, %18 : vector<2x1xf32>
    %c0_16 = arith.constant 0 : index
    %c0_17 = arith.constant 0 : index
    %20 = vector.load %arg7[%c0_16, %c0_17] : memref<2x1xf32, #tpu.memory_space<vmem>>, vector<2x1xf32>
    tpu.vector_store %arg7[%c0_16, %c0_17], %19 {strides = array<i32>} : memref<2x1xf32, #tpu.memory_space<vmem>>, vector<2x1xf32>,
    %c0_18 = arith.constant 0 : index
    %c0_19 = arith.constant 0 : index
    %21 = vector.load %arg8[%c0_18, %c0_19] : memref<2x1xf32, #tpu.memory_space<vmem>>, vector<2x1xf32>
    %22 = arith.mulf %1, %1 : vector<2x256xf32>
    %cst_20 = arith.constant dense<0.000000e+00> : vector<2xf32>
    %23 = vector.multi_reduction <add>, %22, %cst_20 [1] : vector<2x256xf32> to vector<2xf32>
    %24 = vector.shape_cast %23 : vector<2xf32> to vector<2x1xf32>
    %25 = arith.addf %21, %24 : vector<2x1xf32>
    %c0_21 = arith.constant 0 : index
    %c0_22 = arith.constant 0 : index
    %26 = vector.load %arg8[%c0_21, %c0_22] : memref<2x1xf32, #tpu.memory_space<vmem>>, vector<2x1xf32>
    tpu.vector_store %arg8[%c0_21, %c0_22], %25 {strides = array<i32>} : memref<2x1xf32, #tpu.memory_space<vmem>>, vector<2x1xf32>,
    %c0_23 = arith.constant 0 : index
    %c0_24 = arith.constant 0 : index
    %27 = vector.load %arg9[%c0_23, %c0_24] : memref<2x1xf32, #tpu.memory_space<vmem>>, vector<2x1xf32>
    %28 = arith.mulf %0, %1 : vector<2x256xf32>
    %cst_25 = arith.constant dense<0.000000e+00> : vector<2xf32>
    %29 = vector.multi_reduction <add>, %28, %cst_25 [1] : vector<2x256xf32> to vector<2xf32>
    %30 = vector.shape_cast %29 : vector<2xf32> to vector<2x1xf32>
    %31 = arith.addf %27, %30 : vector<2x1xf32>
    %c0_26 = arith.constant 0 : index
    %c0_27 = arith.constant 0 : index
    %32 = vector.load %arg9[%c0_26, %c0_27] : memref<2x1xf32, #tpu.memory_space<vmem>>, vector<2x1xf32>
    tpu.vector_store %arg9[%c0_26, %c0_27], %31 {strides = array<i32>} : memref<2x1xf32, #tpu.memory_space<vmem>>, vector<2x1xf32>,
    %c0_i32_28 = arith.constant 0 : i32
    %33 = arith.cmpi eq, %arg1, %c0_i32_28 : i32
    %34 = arith.extui %33 : i1 to i32
    %c0_i32_29 = arith.constant 0 : i32
    %35 = arith.cmpi ne, %34, %c0_i32_29 : i32
    scf.if %35 {
      %c0_30 = arith.constant 0 : index
      %c0_31 = arith.constant 0 : index
      %36 = vector.load %arg5[%c0_30, %c0_31] : memref<2x1xf32, #tpu.memory_space<vmem>>, vector<2x1xf32>
      %c0_32 = arith.constant 0 : index
      %c0_33 = arith.constant 0 : index
      %37 = vector.load %arg6[%c0_32, %c0_33] : memref<2x1xf32, #tpu.memory_space<vmem>>, vector<2x1xf32>
      %c0_34 = arith.constant 0 : index
      %c0_35 = arith.constant 0 : index
      %38 = vector.load %arg9[%c0_34, %c0_35] : memref<2x1xf32, #tpu.memory_space<vmem>>, vector<2x1xf32>
      %39 = arith.mulf %36, %37 : vector<2x1xf32>
      %cst_36 = arith.constant 3.906250e-03 : f32
      %40 = vector.broadcast %cst_36 : f32 to vector<2x1xf32>
      %41 = arith.mulf %39, %40 : vector<2x1xf32>
      %42 = arith.subf %38, %41 : vector<2x1xf32>
      %c0_37 = arith.constant 0 : index
      %c0_38 = arith.constant 0 : index
      %43 = vector.load %arg7[%c0_37, %c0_38] : memref<2x1xf32, #tpu.memory_space<vmem>>, vector<2x1xf32>
      %44 = arith.mulf %36, %36 : vector<2x1xf32>
      %cst_39 = arith.constant 3.906250e-03 : f32
      %45 = vector.broadcast %cst_39 : f32 to vector<2x1xf32>
      %46 = arith.mulf %44, %45 : vector<2x1xf32>
      %47 = arith.subf %43, %46 : vector<2x1xf32>
      %c0_40 = arith.constant 0 : index
      %c0_41 = arith.constant 0 : index
      %48 = vector.load %arg8[%c0_40, %c0_41] : memref<2x1xf32, #tpu.memory_space<vmem>>, vector<2x1xf32>
      %49 = arith.mulf %37, %37 : vector<2x1xf32>
      %cst_42 = arith.constant 3.906250e-03 : f32
      %50 = vector.broadcast %cst_42 : f32 to vector<2x1xf32>
      %51 = arith.mulf %49, %50 : vector<2x1xf32>
      %52 = arith.subf %48, %51 : vector<2x1xf32>
      %53 = arith.mulf %47, %52 : vector<2x1xf32>
      %54 = math.sqrt %53 : vector<2x1xf32>
      %55 = arith.divf %42, %54 : vector<2x1xf32>
      %56 = vector.shape_cast %55 : vector<2x1xf32> to vector<2x1xf32>
      %57 = vector.broadcast %56 : vector<2x1xf32> to vector<2x128xf32>
      %c0_43 = arith.constant 0 : index
      %c0_44 = arith.constant 0 : index
      %58 = vector.load %arg4[%c0_43, %c0_44] : memref<2x128xf32, #tpu.memory_space<vmem>>, vector<2x128xf32>
      tpu.vector_store %arg4[%c0_43, %c0_44], %57 {strides = array<i32>} : memref<2x128xf32, #tpu.memory_space<vmem>>, vector<2x128xf32>,
    } else {
    }
    return
  }
  func.func @transform_0(%arg0: i32, %arg1: i32) -> (i32, i32) {
    %c0_i32 = arith.constant 0 : i32
    return %arg0, %arg1 : i32, i32
  }
  func.func @transform_1(%arg0: i32, %arg1: i32) -> (i32, i32) {
    %c0_i32 = arith.constant 0 : i32
    return %arg0, %arg1 : i32, i32
  }
  func.func @transform_2(%arg0: i32, %arg1: i32) -> (i32, i32) {
    %c0_i32 = arith.constant 0 : i32
    %c0_i32_0 = arith.constant 0 : i32
    return %arg0, %c0_i32 : i32, i32
  }
}

</mosaic_0001>

<bundles_post_ra>
// kernel: tpu_custom_call.1
= control target key start
LH: loop header
LB: loop body
LE: loop exit
PB: predicated region body
PF: predicated region fallthrough
CT: control target
= control target key end

     0   :  { %7 = vsyncpa [#allocation8], 0  ;;  %s358_s0 = inlined_call_operand.hbm [shape: f32[2,256], index: 0, kind: input, shape index: {}]   ;;  %s359_s1 = inlined_call_operand.hbm [shape: f32[2,256], index: 1, kind: input, shape index: {}]   ;;  %s360_s2 = inlined_call_operand.hbm [shape: f32[2,128], index: 2, kind: output, shape index: {}]  }
   0x1   :  { %8 = vsyncpa [#allocation11], 0 }
   0x2   :  { %9 = vsyncpa [#allocation9], 0  ;;  %s281_s9 = smov [#allocation7]   ;;  %s282_s11 = smov [#allocation10]  }
   0x3   :  { %s16_s10 = sshll.u32 %s281_s9, 4  ;;  %s26_s12 = sshll.u32 %s282_s11, 4  ;;  %s17_s10 = int_to_ptr.vmem [resolvable:$true] %s16_s10  ;;  %s27_s12 = int_to_ptr.vmem [resolvable:$true] %s26_s12 }
   0x4   :  { %s209_s15 = scalar_lea.hbm %s358_s0, 64 }
   0x5   :  { %p210_p0 = scmp.ne.s32.totalorder %s358_s0, %s209_s15  ;;  %p213_p1 = scmp.lt.u32.totalorder %s209_s15, %s358_s0 }
   0x7   :  { %p215_p2 = pnand %p213_p1, %p210_p0 }
   0x9   :  { %218 = shalt.err (!%p215_p2)
}
   0xa   :  { %s219_s20 = scalar_lea.vmem %s17_s10, 64  ;;  %p224_p4 = scmp.lt.s32.totalorder %s17_s10, %s17_s10 }
   0xb   :  { %p220_p3 = scmp.ne.s32.totalorder %s17_s10, %s219_s20  ;;  %p225_p5 = scmp.lt.s32.totalorder %s219_s20, %s219_s20 }
   0xd   :  { %p226_p6 = por %p225_p5, %p224_p4 }
   0xf   :  { %p227_p7 = pnand %p226_p6, %p220_p3 }
  0x11   :  { %230 = shalt.err (!%p227_p7)
}
  0x12   :  { %19 = dma.hbm_to_vmem [thread:$0]  %s358_s0, 64, %s17_s10, [#allocation8]  }
  0x13   :  { %s231_s25 = scalar_lea.hbm %s359_s1, 64 }
  0x14   :  { %p232_p8 = scmp.ne.s32.totalorder %s359_s1, %s231_s25  ;;  %p235_p9 = scmp.lt.u32.totalorder %s231_s25, %s359_s1 }
  0x16   :  { %p237_p10 = pnand %p235_p9, %p232_p8 }
  0x18   :  { %240 = shalt.err (!%p237_p10)
}
  0x19   :  { %s241_s30 = scalar_lea.vmem %s27_s12, 64  ;;  %p246_p12 = scmp.lt.s32.totalorder %s27_s12, %s27_s12 }
  0x1a   :  { %p242_p11 = scmp.ne.s32.totalorder %s27_s12, %s241_s30  ;;  %p247_p13 = scmp.lt.s32.totalorder %s241_s30, %s241_s30 }
  0x1c   :  { %p248_p0 = por %p247_p13, %p246_p12 }
  0x1e   :  { %p249_p1 = pnand %p248_p0, %p242_p11 }
  0x20   :  { %252 = shalt.err (!%p249_p1)
}
  0x21   :  { %29 = dma.hbm_to_vmem [thread:$0]  %s359_s1, 64, %s27_s12, [#allocation11]  }
  0x22   :  { %275 = dma.done.wait [#allocation8], 64  }
  0x23   :  { %276 = vsyncadd [#allocation8], 4294967232 }
  0x24   :  { %277 = dma.done.wait [#allocation11], 64  }
  0x25   :  { %278 = vsyncadd [#allocation11], 4294967232  ;;  %v53_v0 = vlaneseq  ;;  %vm42_vm0 = vcmask 1024   ;;  %v283_v1 = vmov 1983009808   ;;  %v284_v4 = vmov 0.0  }
  0x26   :  { %v51_v2 = vunpack.c.l.s4 %v283_v1  ;;  %43 = vst.msk [vmem:[#allocation2] sm:$0x3] %vm42_vm0, %v284_v4  ;;  %44 = vst.msk [vmem:[#allocation3] sm:$0x3] %vm42_vm0, %v284_v4  ;;  %v36_v7 = vld [vmem:[#allocation7] sm:$0xf] }
  0x27   :  { %v54_v3 = vshrl.u32 %v53_v0, 7  ;;  %45 = vst.msk [vmem:[#allocation4] sm:$0x3] %vm42_vm0, %v284_v4  ;;  %46 = vst.msk [vmem:[#allocation5] sm:$0x3] %vm42_vm0, %v284_v4  ;;  %vm60_vm1 = vcmask 1041408   ;;  %v89_v10 = vmul.f32 %v36_v7, %v36_v7 }
  0x28   :  { %47 = vst.msk [vmem:[#allocation6] sm:$0x3] %vm42_vm0, %v284_v4  ;;  %v52_v5 = vunpack.c.0.s8 %v51_v2  ;;  %v37_v8 = vld [vmem:[#allocation10] sm:$0xf]  ;;  %v285_v37 = vmov 0   ;;  %s286_s1 = smov [#allocation12]  }
  0x29   :  { %v109_v12 = vmul.f32 %v37_v8, %v37_v8  ;;  %v129_v13 = vmul.f32 %v37_v8, %v36_v7  ;;  %203 = vset.pattern.permute.xlu1 %v285_v37  ;;  %204 = vset.pattern.permute.xlu0 %v285_v37  ;;  %s187_s4 = sshll.u32 %s286_s1, 4  ;;  %s188_s4 = int_to_ptr.vmem [resolvable:$true] %s187_s4 }
  0x2a   :  { %v55_v6 = vsub.s32 %v52_v5, %v54_v3  ;;  %s253_s5 = scalar_lea.vmem %s188_s4, 32  ;;  %p258_p3 = scmp.lt.s32.totalorder %s188_s4, %s188_s4 }
  0x2b   :  { %p254_p2 = scmp.ne.s32.totalorder %s188_s4, %s253_s5  ;;  %p259_p4 = scmp.lt.s32.totalorder %s253_s5, %s253_s5 }
  0x2c   :  { %v56_v9 = vrot.slane %v36_v7, %v55_v6  ;;  %v77_v11 = vrot.slane %v37_v8, %v55_v6  ;;  %v97_v16 = vrot.slane %v89_v10, %v55_v6  ;;  %v117_v19 = vrot.slane %v109_v12, %v55_v6 }
  0x2d   :  { %v137_v20 = vrot.slane %v129_v13, %v55_v6  ;;  %v48_v38 = vld [vmem:[#allocation2] sm:$0x3]  ;;  %v69_v43 = vld [vmem:[#allocation3] sm:$0x3]  ;;  %p260_p5 = por %p259_p4, %p258_p3 }
  0x2e   :  { %v57_v14 = vcombine.high %v56_v9, %v56_v9  ;;  %v61_v15 = vsel %vm60_vm1, %v56_v9, 0.0  ;;  %v78_v17 = vcombine.high %v77_v11, %v77_v11  ;;  %v81_v18 = vsel %vm60_vm1, %v77_v11, 0.0  ;;  %v88_v40 = vld [vmem:[#allocation4] sm:$0x3]  ;;  %v108_v46 = vld [vmem:[#allocation5] sm:$0x3] }
  0x2f   :  { %v98_v22 = vcombine.high %v97_v16, %v97_v16  ;;  %v101_v23 = vsel %vm60_vm1, %v97_v16, 0.0  ;;  %v118_v26 = vcombine.high %v117_v19, %v117_v19  ;;  %v121_v28 = vsel %vm60_vm1, %v117_v19, 0.0  ;;  %v128_v49 = vld [vmem:[#allocation6] sm:$0x3]  ;;  %p261_p6 = pnand %p260_p5, %p254_p2 }
  0x30   :  { %v62_v21 = vsel %vm60_vm1, %v57_v14, 0.0  ;;  %v82_v24 = vsel %vm60_vm1, %v78_v17, 0.0  ;;  %v138_v29 = vcombine.high %v137_v20, %v137_v20  ;;  %v141_v33 = vsel %vm60_vm1, %v137_v20, 0.0 }
  0x31   :  { %v63_v25 = vadd.f32 %v62_v21, %v61_v15  ;;  %v102_v27 = vsel %vm60_vm1, %v98_v22, 0.0  ;;  %v83_v31 = vadd.f32 %v82_v24, %v81_v18  ;;  %v122_v32 = vsel %vm60_vm1, %v118_v26, 0.0 }
  0x32   :  { %v103_v30 = vadd.f32 %v102_v27, %v101_v23  ;;  %v142_v34 = vsel %vm60_vm1, %v138_v29, 0.0  ;;  %v123_v35 = vadd.f32 %v122_v32, %v121_v28 }
  0x33   :  { %64 = vadd.xlane.f32.xlu0 %v63_v25  ;;  %v143_v36 = vadd.f32 %v142_v34, %v141_v33 }
  0x34   :  { %104 = vadd.xlane.f32.xlu1 %v103_v30 }
  0x37   :  { %84 = vadd.xlane.f32.xlu0 %v83_v31 }
  0x38   :  { %124 = vadd.xlane.f32.xlu1 %v123_v35 }
  0x3b   :  { %144 = vadd.xlane.f32.xlu0 %v143_v36 }
  0xc0   :  { %v65_v39 = vpop.xlane.xlu0 %64 }
  0xc1   :  { %v66_v41 = vadd.f32 %v65_v39, %v48_v38  ;;  %v105_v42 = vpop.xlane.xlu1 %104 }
  0xc2   :  { %v106_v44 = vadd.f32 %v105_v42, %v88_v40 }
  0xc3   :  { %68 = vst.msk [vmem:[#allocation2] sm:$0x3] %vm42_vm0, %v66_v41 }
  0xc4   :  { %v85_v45 = vpop.xlane.xlu0 %84  ;;  %107 = vst.msk [vmem:[#allocation4] sm:$0x3] %vm42_vm0, %v106_v44 }
  0xc5   :  { %v86_v47 = vadd.f32 %v85_v45, %v69_v43  ;;  %v125_v48 = vpop.xlane.xlu1 %124 }
  0xc6   :  { %v126_v50 = vadd.f32 %v125_v48, %v108_v46 }
  0xc7   :  { %87 = vst.msk [vmem:[#allocation3] sm:$0x3] %vm42_vm0, %v86_v47 }
  0xc8   :  { %v145_v51 = vpop.xlane.xlu0 %144  ;;  %127 = vst.msk [vmem:[#allocation5] sm:$0x3] %vm42_vm0, %v126_v50 }
  0xc9   :  { %v146_v52 = vadd.f32 %v145_v51, %v128_v49 }
  0xca   :  { %v151_v53 = vld [vmem:[#allocation2] sm:$0x3] }
  0xcb   :  { %147 = vst.msk [vmem:[#allocation6] sm:$0x3] %vm42_vm0, %v146_v52  ;;  %v158_v54 = vmul.f32 %v151_v53, %v151_v53  ;;  %v157_v58 = vld [vmem:[#allocation4] sm:$0x3] }
  0xcd   :  { %v159_v56 = vmul.f32 0.00390625, %v158_v54 }
  0xce   :  { %v152_v55 = vld [vmem:[#allocation3] sm:$0x3] }
  0xcf   :  { %v162_v57 = vmul.f32 %v152_v55, %v152_v55  ;;  %v161_v59 = vld [vmem:[#allocation5] sm:$0x3]  ;;  %v160_v61 = vsub.f32 %v157_v58, %v159_v56  ;;  %v154_v5 = vmul.f32 %v152_v55, %v151_v53 }
  0xd1   :  { %v163_v60 = vmul.f32 0.00390625, %v162_v57  ;;  %v155_v6 = vmul.f32 0.00390625, %v154_v5 }
  0xd2   :  { %v153_v7 = vld [vmem:[#allocation6] sm:$0x3] }
  0xd3   :  { %v164_v62 = vsub.f32 %v161_v59, %v163_v60  ;;  %v156_v8 = vsub.f32 %v153_v7, %v155_v6 }
  0xd5   :  { %v165_v63 = vmul.f32 %v164_v62, %v160_v61 }
  0xd7   :  { %205 = vrsqrt.f32 %v165_v63  ;;  %vm168_vm2 = vcmp.eq.f32.partialorder %v165_v63, inf  ;;  %v171_v2 = vand.u32 2147483648, %v165_v63  ;;  %vm170_vm3 = vcmp.eq.f32.partialorder %v165_v63, 0.0 }
  0xe1   :  { %v206_v0 = vpop.eup %205 }
  0xe2   :  { %v167_v1 = vmul.f32 %v206_v0, %v165_v63 }
  0xe4   :  { %v169_v3 = vsel %vm168_vm2, %v165_v63, %v167_v1 }
  0xe5   :  { %v172_v4 = vsel %vm170_vm3, %v171_v2, %v169_v3 }
  0xe6   :  { %207 = vrcp.f32 %v172_v4 }
  0xf0   :  { %v208_v9 = vpop.eup %207 }
  0xf1   :  { %v174_v10 = vmul.f32 %v208_v9, %v156_v8 }
  0xf3   :  { %177 = vperm.xlu1 %203, %v174_v10  }
 0x172   :  { %v178_v11 = vpop.permute.xlu1 %177 }
 0x173   :  { %180 = vst [vmem:[#allocation12] sm:$0x3] %v178_v11 }
 0x174   :  { %264 = shalt.err (!%p261_p6)
}
 0x175   :  { %s265_s8 = scalar_lea.hbm %s360_s2, 32 }
 0x176   :  { %p266_p7 = scmp.ne.s32.totalorder %s360_s2, %s265_s8  ;;  %p269_p8 = scmp.lt.u32.totalorder %s265_s8, %s360_s2 }
 0x178   :  { %p271_p9 = pnand %p269_p8, %p266_p7 }
 0x17a   :  { %274 = shalt.err (!%p271_p9)
}
 0x17b   :  { %190 = dma.vmem_to_hbm [thread:$0]  %s188_s4, 32, %s360_s2, [#allocation9]  }
 0x17c   :  { %279 = dma.done.wait [#allocation9], 32  }
 0x17d   :  { %280 = vsyncadd [#allocation9], 4294967264 }
 0x17e   :  { %194 = vsyncpa [#allocation8], 1 }
 0x17f   :  { %195 = vsyncpa [#allocation11], 1 }
 0x180   :  { %196 = vsyncpa [#allocation9], 1 }

</bundles_post_ra>
